<compile_context>
chip_gen: v7x
topology: tpu7x:2x2x1
jax: 0.10.0
libtpu: 0.0.40
codegen_flags: <defaults>
</compile_context>

<pallas_src>
import jax
import jax.numpy as jnp
from jax.experimental import pallas as pl
from jax.experimental.pallas import tpu as pltpu

_BN_EPS = 1e-5
_VMEM_LIMIT_BYTES = 32 * 1024 * 1024   # safe scoped budget on v5e/v6e/v7x
_TILE_ROWS_CONV = 2048                 # dense rows (= 4 pixels each when packed)
_TILE_ROWS_POOL = 4096                 # pixel rows for the fused pool kernel


def _round_up(x, m):
    return ((x + m - 1) // m) * m


def _choose_tile(rows, max_rows):
    """Row-tile: sublane-aligned (16), >=2 grid steps when possible (v7x
    megacore), capped so double-buffered streams fit the VMEM budget."""
    if rows <= 16:
        return rows                      # single full block
    t = _round_up(pl.cdiv(rows, 2), 16)  # at least two grid steps
    return min(max_rows, t)


def _pack_factor(M):
    """Lane-density packing factor: view [M, C] as [M/P, P*C] (free bitcast)."""
    for p in (4, 2):
        if M % p == 0:
            return p
    return 1


# ---------------------------------------------------------------------------
# Pallas kernels
# ---------------------------------------------------------------------------
def _matmul_bias_relu_kernel(x_ref, w_ref, b_ref, o_ref):
    # x: [tm, K] bf16, w: [K, N] bf16 (BN scale folded), b: [1, N] f32
    acc = jnp.dot(x_ref[...], w_ref[...], preferred_element_type=jnp.float32)
    o_ref[...] = jnp.maximum(acc + b_ref[...], 0.0).astype(o_ref.dtype)


def _stem1_2a_kernel(x_ref, w1_ref, b1_ref, w2_ref, b2_ref, o1_ref, o2_ref):
    # Fused stem_1 (conv+BN+ReLU) and stem_2a (1x1 conv+BN+ReLU) epilogue.
    acc1 = jnp.dot(x_ref[...], w1_ref[...], preferred_element_type=jnp.float32)
    s1 = jnp.maximum(acc1 + b1_ref[...], 0.0).astype(jnp.bfloat16)
    o1_ref[...] = s1.astype(o1_ref.dtype)
    acc2 = jnp.dot(s1, w2_ref[...], preferred_element_type=jnp.float32)
    o2_ref[...] = jnp.maximum(acc2 + b2_ref[...], 0.0).astype(o2_ref.dtype)


def _pool_cat_1x1_kernel(x2b_ref, even_ref, odd_ref, wt_ref, wb_ref, b_ref, o_ref):
    # Fused MaxPool2d(2,2)(stem_1) ++ concat ++ stem_3 1x1 conv + BN + ReLU.
    # even/odd: [tm, 2C] rows = (left pixel C ch, right pixel C ch) per output px.
    C = wt_ref.shape[0]
    eo = jnp.maximum(even_ref[...], odd_ref[...])          # max over H pair
    pooled = jnp.maximum(eo[:, :C], eo[:, C:])              # max over W pair
    acc = jnp.dot(x2b_ref[...], wt_ref[...], preferred_element_type=jnp.float32)
    acc = acc + jnp.dot(pooled, wb_ref[...], preferred_element_type=jnp.float32)
    o_ref[...] = jnp.maximum(acc + b_ref[...], 0.0).astype(o_ref.dtype)


# ---------------------------------------------------------------------------
# pallas_call wrappers (tiled over rows, "parallel" grid axis)
# ---------------------------------------------------------------------------
def matmul_bias_relu(x_mat, w_mat, bias, out_dtype):
    """x:[M,K] bf16 @ w:[K,N] bf16 + bias:[1,N] f32, ReLU -> [M,N] out_dtype."""
    M, K = x_mat.shape
    Nc = w_mat.shape[1]
    tm = _choose_tile(M, _TILE_ROWS_CONV)
    return pl.pallas_call(
        _matmul_bias_relu_kernel,
        out_shape=jax.ShapeDtypeStruct((M, Nc), out_dtype),
        grid=(pl.cdiv(M, tm),),
        in_specs=[
            pl.BlockSpec((tm, K), lambda i: (i, 0)),    # streamed over rows
            pl.BlockSpec((K, Nc), lambda i: (0, 0)),    # weights resident
            pl.BlockSpec((1, Nc), lambda i: (0, 0)),    # bias resident
        ],
        out_specs=pl.BlockSpec((tm, Nc), lambda i: (i, 0)),
        compiler_params=pltpu.CompilerParams(
            dimension_semantics=("parallel",),
            vmem_limit_bytes=_VMEM_LIMIT_BYTES),
    )(x_mat, w_mat, bias)


def fused_stem1_stem2a(x_mat, w1, b1, w2, b2, out_dtype=jnp.bfloat16):
    """One pallas_call producing both stem_1 and stem_2a outputs (dense-packed)."""
    M, K = x_mat.shape
    N1 = w1.shape[1]
    N2 = w2.shape[1]
    tm = _choose_tile(M, _TILE_ROWS_CONV)
    return pl.pallas_call(
        _stem1_2a_kernel,
        out_shape=(jax.ShapeDtypeStruct((M, N1), out_dtype),
                   jax.ShapeDtypeStruct((M, N2), out_dtype)),
        grid=(pl.cdiv(M, tm),),
        in_specs=[
            pl.BlockSpec((tm, K), lambda i: (i, 0)),
            pl.BlockSpec((K, N1), lambda i: (0, 0)),
            pl.BlockSpec((1, N1), lambda i: (0, 0)),
            pl.BlockSpec((N1, N2), lambda i: (0, 0)),
            pl.BlockSpec((1, N2), lambda i: (0, 0)),
        ],
        out_specs=(pl.BlockSpec((tm, N1), lambda i: (i, 0)),
                   pl.BlockSpec((tm, N2), lambda i: (i, 0))),
        compiler_params=pltpu.CompilerParams(
            dimension_semantics=("parallel",),
            vmem_limit_bytes=_VMEM_LIMIT_BYTES),
    )(x_mat, w1, b1, w2, b2)


def pool_cat_1x1(x2b, even, odd, w_top, w_bot, bias, out_dtype):
    """relu( x2b @ w_top + maxpool2x2(stem_1) @ w_bot + bias ), row-tiled."""
    M, C = x2b.shape
    Nc = w_top.shape[1]
    tm = _choose_tile(M, _TILE_ROWS_POOL)
    return pl.pallas_call(
        _pool_cat_1x1_kernel,
        out_shape=jax.ShapeDtypeStruct((M, Nc), out_dtype),
        grid=(pl.cdiv(M, tm),),
        in_specs=[
            pl.BlockSpec((tm, C), lambda i: (i, 0)),
            pl.BlockSpec((tm, 2 * C), lambda i: (i, 0)),
            pl.BlockSpec((tm, 2 * C), lambda i: (i, 0)),
            pl.BlockSpec((C, Nc), lambda i: (0, 0)),
            pl.BlockSpec((C, Nc), lambda i: (0, 0)),
            pl.BlockSpec((1, Nc), lambda i: (0, 0)),
        ],
        out_specs=pl.BlockSpec((tm, Nc), lambda i: (i, 0)),
        compiler_params=pltpu.CompilerParams(
            dimension_semantics=("parallel",),
            vmem_limit_bytes=_VMEM_LIMIT_BYTES),
    )(x2b, even, odd, w_top, w_bot, bias)


# ---------------------------------------------------------------------------
# Glue: im2col (3x3 convs only), BN folding, dense-pack helpers
# ---------------------------------------------------------------------------
def _im2col(x_nhwc, ksize, stride, pad):
    """Patches [N*Ho*Wo, k*k*C] in (kh, kw, cin) order — one concatenate."""
    N, H, W, C = x_nhwc.shape
    if pad:
        x_nhwc = jnp.pad(x_nhwc, ((0, 0), (pad, pad), (pad, pad), (0, 0)))
    Ho = (H + 2 * pad - ksize) // stride + 1
    Wo = (W + 2 * pad - ksize) // stride + 1
    cols = []
    for ki in range(ksize):
        for kj in range(ksize):
            cols.append(x_nhwc[:, ki:ki + stride * (Ho - 1) + 1:stride,
                                  kj:kj + stride * (Wo - 1) + 1:stride, :])
    patches = jnp.concatenate(cols, axis=-1)              # [N, Ho, Wo, k*k*C]
    return patches.reshape(N * Ho * Wo, ksize * ksize * C), Ho, Wo


def _fold_bn_into_weight(w, gamma, beta, mean, var):
    """torch weight [Cout,Cin,kh,kw] -> (bf16 [K,Cout] with BN scale folded,
    f32 [1,Cout] bias).  K ordering is (kh, kw, cin) to match _im2col."""
    cout = w.shape[0]
    scale = (gamma / jnp.sqrt(var + _BN_EPS)).astype(jnp.float32)
    bias = (beta - mean * scale).reshape(1, cout).astype(jnp.float32)
    w_mat = jnp.transpose(w, (2, 3, 1, 0)).reshape(-1, cout).astype(jnp.float32)
    w_mat = (w_mat * scale[None, :]).astype(jnp.bfloat16)
    return w_mat, bias


def _block_diag(w, p):
    """[K, C] -> block-diagonal [p*K, p*C] so that the [M/p, p*K] dense view of
    the input times this weight yields the [M/p, p*C] dense view of the output
    (pure row-major bitcasts outside the kernel, unmasked 128-lane stores inside)."""
    if p == 1:
        return w
    K, C = w.shape
    out = jnp.zeros((p * K, p * C), w.dtype)
    for i in range(p):
        out = out.at[i * K:(i + 1) * K, i * C:(i + 1) * C].set(w)
    return out


def _tile_bias(b, p):
    return jnp.tile(b, (1, p)) if p > 1 else b


# ---------------------------------------------------------------------------
# StemBlock parameters + forward
# ---------------------------------------------------------------------------
def make_conv_bn_params(key, cin, cout, k):
    kw, kg, kb, km, kv = jax.random.split(key, 5)
    w = 0.1 * jax.random.normal(kw, (cout, cin, k, k), jnp.float32)
    gamma = 1.0 + 0.1 * jax.random.normal(kg, (cout,), jnp.float32)
    beta = 0.1 * jax.random.normal(kb, (cout,), jnp.float32)
    mean = 0.1 * jax.random.normal(km, (cout,), jnp.float32)
    var = jnp.abs(jax.random.normal(kv, (cout,), jnp.float32)) + 0.5
    return (w, gamma, beta, mean, var)


def init_stem_params(key, inp=3, num_init_features=32):
    k1, k2a, k2b, k3 = jax.random.split(key, 4)
    half = num_init_features // 2
    return {
        "stem_1":  make_conv_bn_params(k1,  inp,                   num_init_features, 3),
        "stem_2a": make_conv_bn_params(k2a, num_init_features,     half,              1),
        "stem_2b": make_conv_bn_params(k2b, half,                  num_init_features, 3),
        "stem_3":  make_conv_bn_params(k3,  num_init_features * 2, num_init_features, 1),
    }


def stem_block_forward(x_nchw, params):
    # NCHW (PyTorch) -> NHWC, bf16 activations (f32 accumulation in-kernel).
    x = jnp.transpose(x_nchw, (0, 2, 3, 1)).astype(jnp.bfloat16)
    N = x.shape[0]
    nif = params["stem_1"][0].shape[0]          # num_init_features
    half = params["stem_2a"][0].shape[0]

    # ---- stem_1 (3x3 s2 p1) fused with stem_2a (1x1), lane-dense outputs ----
    w1, b1 = _fold_bn_into_weight(*params["stem_1"])     # [9*Cin, nif]
    w2a, b2a = _fold_bn_into_weight(*params["stem_2a"])  # [nif, half]
    x1_mat, H1, W1 = _im2col(x, 3, 2, 1)
    M1 = N * H1 * W1
    P1 = _pack_factor(M1)
    s1_d, s2a_d = fused_stem1_stem2a(
        x1_mat.reshape(M1 // P1, P1 * x1_mat.shape[1]),   # free bitcast
        _block_diag(w1, P1), _tile_bias(b1, P1),
        _block_diag(w2a, P1), _tile_bias(b2a, P1))
    s1_nhwc = s1_d.reshape(N, H1, W1, nif)                # free bitcast
    s2a_nhwc = s2a_d.reshape(N, H1, W1, half)             # free bitcast

    # ---- stem_2b (3x3 s2 p1), lane-dense output ------------------------------
    w2b, b2b = _fold_bn_into_weight(*params["stem_2b"])   # [9*half, nif]
    x2b_mat, H2, W2 = _im2col(s2a_nhwc, 3, 2, 1)
    M2 = N * H2 * W2
    P2 = _pack_factor(M2)
    s2b_d = matmul_bias_relu(
        x2b_mat.reshape(M2 // P2, P2 * x2b_mat.shape[1]),
        _block_diag(w2b, P2), _tile_bias(b2b, P2), jnp.bfloat16)
    x2b_flat = s2b_d.reshape(M2, nif)                     # free bitcast

    # ---- MaxPool2d(2,2)(stem_1) ++ concat ++ stem_3 (1x1), fused -------------
    w3, b3 = _fold_bn_into_weight(*params["stem_3"])      # [2*nif, nif]
    Hp, Wp = H1 // 2, W1 // 2                             # floor, like MaxPool2d
    assert (Hp, Wp) == (H2, W2), "StemBlock requires even stem_1 spatial dims"
    s1c = s1_nhwc[:, :2 * Hp, :2 * Wp, :]
    # even/odd spatial rows; each row of the [M2, 2*nif] view holds the
    # (left pixel, right pixel) channel pair for one pooled output pixel.
    even = s1c[:, 0::2].reshape(M2, 2 * nif)
    odd = s1c[:, 1::2].reshape(M2, 2 * nif)
    out_flat = pool_cat_1x1(x2b_flat, even, odd,
                            w3[:nif, :], w3[nif:, :], b3, jnp.bfloat16)
    out = out_flat.reshape(N, H2, W2, nif)

    # NHWC -> NCHW, upcast bf16 -> f32 during the transpose.
    return jnp.transpose(out, (0, 3, 1, 2)).astype(jnp.float32)


# ---------------------------------------------------------------------------
# Pure-JAX reference (eval-mode BN) for a sanity check
# ---------------------------------------------------------------------------
def _conv_bn_relu_ref(x_nhwc, params, stride, pad):
    w, gamma, beta, mean, var = params
    w_hwio = jnp.transpose(w, (2, 3, 1, 0)).astype(jnp.float32)
    y = jax.lax.conv_general_dilated(
        x_nhwc.astype(jnp.float32), w_hwio,
        window_strides=(stride, stride),
        padding=[(pad, pad), (pad, pad)],
        dimension_numbers=("NHWC", "HWIO", "NHWC"))
    scale = gamma / jnp.sqrt(var + _BN_EPS)
    return jnp.maximum(y * scale + (beta - mean * scale), 0.0)


def _stem_ref(x_nchw, params):
    x = jnp.transpose(x_nchw, (0, 2, 3, 1)).astype(jnp.float32)
    s1 = _conv_bn_relu_ref(x, params["stem_1"], 2, 1)
    s2a = _conv_bn_relu_ref(s1, params["stem_2a"], 1, 0)
    s2b = _conv_bn_relu_ref(s2a, params["stem_2b"], 2, 1)
    s2p = jax.lax.reduce_window(s1, -jnp.inf, jax.lax.max,
                                (1, 2, 2, 1), (1, 2, 2, 1), "VALID")
    cat = jnp.concatenate([s2b, s2p], axis=-1)
    out = _conv_bn_relu_ref(cat, params["stem_3"], 1, 0)
    return jnp.transpose(out, (0, 3, 1, 2))


# ---------------------------------------------------------------------------
if __name__ == "__main__":
    key = jax.random.PRNGKey(0)
    k_x, k_p = jax.random.split(key)

    # input consistent with StemBlock(inp=3): [batch=2, C=3, H=16, W=16]
    x = jax.random.normal(k_x, (2, 3, 16, 16), jnp.float32)
    params = init_stem_params(k_p, inp=3, num_init_features=32)

    fwd = jax.jit(stem_block_forward)
    out = jax.block_until_ready(fwd(x, params))

    assert out.shape == (2, 32, 4, 4), out.shape
    assert out.dtype == jnp.float32

    # loose tolerance: activations/weights are bf16, accumulation is f32
    ref = _stem_ref(x, params)
    max_diff = float(jnp.max(jnp.abs(out - ref)))
    assert max_diff < 0.2, f"max |pallas - ref| = {max_diff}"

    print("KERNEL_OK")
</pallas_src>

<mosaic_0001>
module attributes {stable_mosaic.version = 11 : i64} {
  func.func @_stem1_2a_kernel(%arg0: i32, %arg1: memref<16x108xbf16, #tpu.memory_space<vmem>>, %arg2: memref<108x128xbf16, #tpu.memory_space<vmem>>, %arg3: memref<1x128xf32, #tpu.memory_space<vmem>>, %arg4: memref<128x64xbf16, #tpu.memory_space<vmem>>, %arg5: memref<1x64xf32, #tpu.memory_space<vmem>>, %arg6: memref<16x128xbf16, #tpu.memory_space<vmem>>, %arg7: memref<16x64xbf16, #tpu.memory_space<vmem>>) attributes {dimension_semantics = [#tpu.dimension_semantics<parallel>], iteration_bounds = array<i64: 2>, scalar_prefetch = 0 : i64, scratch_operands = 0 : i64, tpu.core_type = #tpu.core_type<tc>, window_params = [{transform_indices = @transform_0, window_bounds = array<i64: 16, 108>}, {pipeline_mode = #tpu.pipeline_mode<synchronous>, transform_indices = @transform_1, window_bounds = array<i64: 108, 128>}, {pipeline_mode = #tpu.pipeline_mode<synchronous>, transform_indices = @transform_2, window_bounds = array<i64: 1, 128>}, {pipeline_mode = #tpu.pipeline_mode<synchronous>, transform_indices = @transform_3, window_bounds = array<i64: 128, 64>}, {pipeline_mode = #tpu.pipeline_mode<synchronous>, transform_indices = @transform_4, window_bounds = array<i64: 1, 64>}, {transform_indices = @transform_5, window_bounds = array<i64: 16, 128>}, {transform_indices = @transform_6, window_bounds = array<i64: 16, 64>}]} {
    %c0 = arith.constant 0 : index
    %c0_0 = arith.constant 0 : index
    %0 = vector.load %arg1[%c0, %c0_0] : memref<16x108xbf16, #tpu.memory_space<vmem>>, vector<16x108xbf16>
    %c0_1 = arith.constant 0 : index
    %c0_2 = arith.constant 0 : index
    %1 = vector.load %arg2[%c0_1, %c0_2] : memref<108x128xbf16, #tpu.memory_space<vmem>>, vector<108x128xbf16>
    %cst = arith.constant dense<0.000000e+00> : vector<16x128xf32>
    %2 = tpu.matmul %0, %1, %cst {dimension_numbers = #tpu.dot_dimension_numbers<[1], [0], [0], [1], [0, 0, 1, 1], [], []>} : vector<16x108xbf16>, vector<108x128xbf16>, vector<16x128xf32> -> vector<16x128xf32>
    %c0_3 = arith.constant 0 : index
    %c0_4 = arith.constant 0 : index
    %3 = vector.load %arg3[%c0_3, %c0_4] : memref<1x128xf32, #tpu.memory_space<vmem>>, vector<1x128xf32>
    %4 = vector.broadcast %3 : vector<1x128xf32> to vector<16x128xf32>
    %5 = arith.addf %2, %4 : vector<16x128xf32>
    %cst_5 = arith.constant 0.000000e+00 : f32
    %6 = vector.broadcast %cst_5 : f32 to vector<16x128xf32>
    %7 = arith.maximumf %5, %6 : vector<16x128xf32>
    %8 = arith.truncf %7 : vector<16x128xf32> to vector<16x128xbf16>
    %c0_6 = arith.constant 0 : index
    %c0_7 = arith.constant 0 : index
    %9 = vector.load %arg6[%c0_6, %c0_7] : memref<16x128xbf16, #tpu.memory_space<vmem>>, vector<16x128xbf16>
    tpu.vector_store %arg6[%c0_6, %c0_7], %8 {strides = array<i32>} : memref<16x128xbf16, #tpu.memory_space<vmem>>, vector<16x128xbf16>,
    %c0_8 = arith.constant 0 : index
    %c0_9 = arith.constant 0 : index
    %10 = vector.load %arg4[%c0_8, %c0_9] : memref<128x64xbf16, #tpu.memory_space<vmem>>, vector<128x64xbf16>
    %cst_10 = arith.constant dense<0.000000e+00> : vector<16x64xf32>
    %11 = tpu.matmul %8, %10, %cst_10 {dimension_numbers = #tpu.dot_dimension_numbers<[1], [0], [0], [1], [0, 0, 1, 1], [], []>} : vector<16x128xbf16>, vector<128x64xbf16>, vector<16x64xf32> -> vector<16x64xf32>
    %c0_11 = arith.constant 0 : index
    %c0_12 = arith.constant 0 : index
    %12 = vector.load %arg5[%c0_11, %c0_12] : memref<1x64xf32, #tpu.memory_space<vmem>>, vector<1x64xf32>
    %13 = vector.broadcast %12 : vector<1x64xf32> to vector<16x64xf32>
    %14 = arith.addf %11, %13 : vector<16x64xf32>
    %cst_13 = arith.constant 0.000000e+00 : f32
    %15 = vector.broadcast %cst_13 : f32 to vector<16x64xf32>
    %16 = arith.maximumf %14, %15 : vector<16x64xf32>
    %17 = arith.truncf %16 : vector<16x64xf32> to vector<16x64xbf16>
    %c0_14 = arith.constant 0 : index
    %c0_15 = arith.constant 0 : index
    %18 = vector.load %arg7[%c0_14, %c0_15] : memref<16x64xbf16, #tpu.memory_space<vmem>>, vector<16x64xbf16>
    tpu.vector_store %arg7[%c0_14, %c0_15], %17 {strides = array<i32>} : memref<16x64xbf16, #tpu.memory_space<vmem>>, vector<16x64xbf16>,
    return
  }
  func.func @transform_0(%arg0: i32) -> (i32, i32) {
    %c0_i32 = arith.constant 0 : i32
    %c0_i32_0 = arith.constant 0 : i32
    return %arg0, %c0_i32 : i32, i32
  }
  func.func @transform_1(%arg0: i32) -> (i32, i32) {
    %c0_i32 = arith.constant 0 : i32
    %c0_i32_0 = arith.constant 0 : i32
    %c0_i32_1 = arith.constant 0 : i32
    return %c0_i32, %c0_i32_0 : i32, i32
  }
  func.func @transform_2(%arg0: i32) -> (i32, i32) {
    %c0_i32 = arith.constant 0 : i32
    %c0_i32_0 = arith.constant 0 : i32
    %c0_i32_1 = arith.constant 0 : i32
    return %c0_i32, %c0_i32_0 : i32, i32
  }
  func.func @transform_3(%arg0: i32) -> (i32, i32) {
    %c0_i32 = arith.constant 0 : i32
    %c0_i32_0 = arith.constant 0 : i32
    %c0_i32_1 = arith.constant 0 : i32
    return %c0_i32, %c0_i32_0 : i32, i32
  }
  func.func @transform_4(%arg0: i32) -> (i32, i32) {
    %c0_i32 = arith.constant 0 : i32
    %c0_i32_0 = arith.constant 0 : i32
    %c0_i32_1 = arith.constant 0 : i32
    return %c0_i32, %c0_i32_0 : i32, i32
  }
  func.func @transform_5(%arg0: i32) -> (i32, i32) {
    %c0_i32 = arith.constant 0 : i32
    %c0_i32_0 = arith.constant 0 : i32
    return %arg0, %c0_i32 : i32, i32
  }
  func.func @transform_6(%arg0: i32) -> (i32, i32) {
    %c0_i32 = arith.constant 0 : i32
    %c0_i32_0 = arith.constant 0 : i32
    return %arg0, %c0_i32 : i32, i32
  }
}

module attributes {stable_mosaic.version = 11 : i64} {
  func.func @_matmul_bias_relu_kernel(%arg0: i32, %arg1: memref<8x576xbf16, #tpu.memory_space<vmem>>, %arg2: memref<576x128xbf16, #tpu.memory_space<vmem>>, %arg3: memref<1x128xf32, #tpu.memory_space<vmem>>, %arg4: memref<8x128xbf16, #tpu.memory_space<vmem>>) attributes {dimension_semantics = [#tpu.dimension_semantics<parallel>], iteration_bounds = array<i64: 1>, scalar_prefetch = 0 : i64, scratch_operands = 0 : i64, tpu.core_type = #tpu.core_type<tc>, window_params = [{transform_indices = @transform_0, window_bounds = array<i64: 8, 576>}, {pipeline_mode = #tpu.pipeline_mode<synchronous>, transform_indices = @transform_1, window_bounds = array<i64: 576, 128>}, {pipeline_mode = #tpu.pipeline_mode<synchronous>, transform_indices = @transform_2, window_bounds = array<i64: 1, 128>}, {transform_indices = @transform_3, window_bounds = array<i64: 8, 128>}]} {
    %c0 = arith.constant 0 : index
    %c0_0 = arith.constant 0 : index
    %0 = vector.load %arg1[%c0, %c0_0] : memref<8x576xbf16, #tpu.memory_space<vmem>>, vector<8x576xbf16>
    %c0_1 = arith.constant 0 : index
    %c0_2 = arith.constant 0 : index
    %1 = vector.load %arg2[%c0_1, %c0_2] : memref<576x128xbf16, #tpu.memory_space<vmem>>, vector<576x128xbf16>
    %cst = arith.constant dense<0.000000e+00> : vector<8x128xf32>
    %2 = tpu.matmul %0, %1, %cst {dimension_numbers = #tpu.dot_dimension_numbers<[1], [0], [0], [1], [0, 0, 1, 1], [], []>} : vector<8x576xbf16>, vector<576x128xbf16>, vector<8x128xf32> -> vector<8x128xf32>
    %c0_3 = arith.constant 0 : index
    %c0_4 = arith.constant 0 : index
    %3 = vector.load %arg3[%c0_3, %c0_4] : memref<1x128xf32, #tpu.memory_space<vmem>>, vector<1x128xf32>
    %4 = vector.broadcast %3 : vector<1x128xf32> to vector<8x128xf32>
    %5 = arith.addf %2, %4 : vector<8x128xf32>
    %cst_5 = arith.constant 0.000000e+00 : f32
    %6 = vector.broadcast %cst_5 : f32 to vector<8x128xf32>
    %7 = arith.maximumf %5, %6 : vector<8x128xf32>
    %8 = arith.truncf %7 : vector<8x128xf32> to vector<8x128xbf16>
    %c0_6 = arith.constant 0 : index
    %c0_7 = arith.constant 0 : index
    %9 = vector.load %arg4[%c0_6, %c0_7] : memref<8x128xbf16, #tpu.memory_space<vmem>>, vector<8x128xbf16>
    tpu.vector_store %arg4[%c0_6, %c0_7], %8 {strides = array<i32>} : memref<8x128xbf16, #tpu.memory_space<vmem>>, vector<8x128xbf16>,
    return
  }
  func.func @transform_0(%arg0: i32) -> (i32, i32) {
    %c0_i32 = arith.constant 0 : i32
    %c0_i32_0 = arith.constant 0 : i32
    return %arg0, %c0_i32 : i32, i32
  }
  func.func @transform_1(%arg0: i32) -> (i32, i32) {
    %c0_i32 = arith.constant 0 : i32
    %c0_i32_0 = arith.constant 0 : i32
    %c0_i32_1 = arith.constant 0 : i32
    return %c0_i32, %c0_i32_0 : i32, i32
  }
  func.func @transform_2(%arg0: i32) -> (i32, i32) {
    %c0_i32 = arith.constant 0 : i32
    %c0_i32_0 = arith.constant 0 : i32
    %c0_i32_1 = arith.constant 0 : i32
    return %c0_i32, %c0_i32_0 : i32, i32
  }
  func.func @transform_3(%arg0: i32) -> (i32, i32) {
    %c0_i32 = arith.constant 0 : i32
    %c0_i32_0 = arith.constant 0 : i32
    return %arg0, %c0_i32 : i32, i32
  }
}

module attributes {stable_mosaic.version = 11 : i64} {
  func.func @_pool_cat_1x1_kernel(%arg0: i32, %arg1: memref<16x32xbf16, #tpu.memory_space<vmem>>, %arg2: memref<16x64xbf16, #tpu.memory_space<vmem>>, %arg3: memref<16x64xbf16, #tpu.memory_space<vmem>>, %arg4: memref<32x32xbf16, #tpu.memory_space<vmem>>, %arg5: memref<32x32xbf16, #tpu.memory_space<vmem>>, %arg6: memref<1x32xf32, #tpu.memory_space<vmem>>, %arg7: memref<16x32xbf16, #tpu.memory_space<vmem>>) attributes {dimension_semantics = [#tpu.dimension_semantics<parallel>], iteration_bounds = array<i64: 2>, scalar_prefetch = 0 : i64, scratch_operands = 0 : i64, tpu.core_type = #tpu.core_type<tc>, window_params = [{transform_indices = @transform_0, window_bounds = array<i64: 16, 32>}, {transform_indices = @transform_1, window_bounds = array<i64: 16, 64>}, {transform_indices = @transform_2, window_bounds = array<i64: 16, 64>}, {pipeline_mode = #tpu.pipeline_mode<synchronous>, transform_indices = @transform_3, window_bounds = array<i64: 32, 32>}, {pipeline_mode = #tpu.pipeline_mode<synchronous>, transform_indices = @transform_4, window_bounds = array<i64: 32, 32>}, {pipeline_mode = #tpu.pipeline_mode<synchronous>, transform_indices = @transform_5, window_bounds = array<i64: 1, 32>}, {transform_indices = @transform_6, window_bounds = array<i64: 16, 32>}]} {
    %c0 = arith.constant 0 : index
    %c0_0 = arith.constant 0 : index
    %0 = vector.load %arg2[%c0, %c0_0] : memref<16x64xbf16, #tpu.memory_space<vmem>>, vector<16x64xbf16>
    %c0_1 = arith.constant 0 : index
    %c0_2 = arith.constant 0 : index
    %1 = vector.load %arg3[%c0_1, %c0_2] : memref<16x64xbf16, #tpu.memory_space<vmem>>, vector<16x64xbf16>
    %2 = arith.maximumf %0, %1 : vector<16x64xbf16>
    %3 = vector.extract_strided_slice %2 {offsets = [0, 0], sizes = [16, 32], strides = [1, 1]} : vector<16x64xbf16> to vector<16x32xbf16>
    %4 = vector.extract_strided_slice %2 {offsets = [0, 32], sizes = [16, 32], strides = [1, 1]} : vector<16x64xbf16> to vector<16x32xbf16>
    %5 = arith.maximumf %3, %4 : vector<16x32xbf16>
    %c0_3 = arith.constant 0 : index
    %c0_4 = arith.constant 0 : index
    %6 = vector.load %arg1[%c0_3, %c0_4] : memref<16x32xbf16, #tpu.memory_space<vmem>>, vector<16x32xbf16>
    %c0_5 = arith.constant 0 : index
    %c0_6 = arith.constant 0 : index
    %7 = vector.load %arg4[%c0_5, %c0_6] : memref<32x32xbf16, #tpu.memory_space<vmem>>, vector<32x32xbf16>
    %cst = arith.constant dense<0.000000e+00> : vector<16x32xf32>
    %8 = tpu.matmul %6, %7, %cst {dimension_numbers = #tpu.dot_dimension_numbers<[1], [0], [0], [1], [0, 0, 1, 1], [], []>} : vector<16x32xbf16>, vector<32x32xbf16>, vector<16x32xf32> -> vector<16x32xf32>
    %c0_7 = arith.constant 0 : index
    %c0_8 = arith.constant 0 : index
    %9 = vector.load %arg5[%c0_7, %c0_8] : memref<32x32xbf16, #tpu.memory_space<vmem>>, vector<32x32xbf16>
    %cst_9 = arith.constant dense<0.000000e+00> : vector<16x32xf32>
    %10 = tpu.matmul %5, %9, %cst_9 {dimension_numbers = #tpu.dot_dimension_numbers<[1], [0], [0], [1], [0, 0, 1, 1], [], []>} : vector<16x32xbf16>, vector<32x32xbf16>, vector<16x32xf32> -> vector<16x32xf32>
    %11 = arith.addf %8, %10 : vector<16x32xf32>
    %c0_10 = arith.constant 0 : index
    %c0_11 = arith.constant 0 : index
    %12 = vector.load %arg6[%c0_10, %c0_11] : memref<1x32xf32, #tpu.memory_space<vmem>>, vector<1x32xf32>
    %13 = vector.broadcast %12 : vector<1x32xf32> to vector<16x32xf32>
    %14 = arith.addf %11, %13 : vector<16x32xf32>
    %cst_12 = arith.constant 0.000000e+00 : f32
    %15 = vector.broadcast %cst_12 : f32 to vector<16x32xf32>
    %16 = arith.maximumf %14, %15 : vector<16x32xf32>
    %17 = arith.truncf %16 : vector<16x32xf32> to vector<16x32xbf16>
    %c0_13 = arith.constant 0 : index
    %c0_14 = arith.constant 0 : index
    %18 = vector.load %arg7[%c0_13, %c0_14] : memref<16x32xbf16, #tpu.memory_space<vmem>>, vector<16x32xbf16>
    tpu.vector_store %arg7[%c0_13, %c0_14], %17 {strides = array<i32>} : memref<16x32xbf16, #tpu.memory_space<vmem>>, vector<16x32xbf16>,
    return
  }
  func.func @transform_0(%arg0: i32) -> (i32, i32) {
    %c0_i32 = arith.constant 0 : i32
    %c0_i32_0 = arith.constant 0 : i32
    return %arg0, %c0_i32 : i32, i32
  }
  func.func @transform_1(%arg0: i32) -> (i32, i32) {
    %c0_i32 = arith.constant 0 : i32
    %c0_i32_0 = arith.constant 0 : i32
    return %arg0, %c0_i32 : i32, i32
  }
  func.func @transform_2(%arg0: i32) -> (i32, i32) {
    %c0_i32 = arith.constant 0 : i32
    %c0_i32_0 = arith.constant 0 : i32
    return %arg0, %c0_i32 : i32, i32
  }
  func.func @transform_3(%arg0: i32) -> (i32, i32) {
    %c0_i32 = arith.constant 0 : i32
    %c0_i32_0 = arith.constant 0 : i32
    %c0_i32_1 = arith.constant 0 : i32
    return %c0_i32, %c0_i32_0 : i32, i32
  }
  func.func @transform_4(%arg0: i32) -> (i32, i32) {
    %c0_i32 = arith.constant 0 : i32
    %c0_i32_0 = arith.constant 0 : i32
    %c0_i32_1 = arith.constant 0 : i32
    return %c0_i32, %c0_i32_0 : i32, i32
  }
  func.func @transform_5(%arg0: i32) -> (i32, i32) {
    %c0_i32 = arith.constant 0 : i32
    %c0_i32_0 = arith.constant 0 : i32
    %c0_i32_1 = arith.constant 0 : i32
    return %c0_i32, %c0_i32_0 : i32, i32
  }
  func.func @transform_6(%arg0: i32) -> (i32, i32) {
    %c0_i32 = arith.constant 0 : i32
    %c0_i32_0 = arith.constant 0 : i32
    return %arg0, %c0_i32 : i32, i32
  }
}

</mosaic_0001>

<bundles_post_ra>
// kernel: stem_block_forward.3
= control target key start
LH: loop header
LB: loop body
LE: loop exit
PB: predicated region body
PF: predicated region fallthrough
CT: control target
= control target key end

     0   :  { %s786_s21 = smov 0   ;;  %s862_s0 = inlined_call_operand.vmem [shape: bf16[32,108], index: 0, kind: input, shape index: {}]   ;;  %s863_s1 = inlined_call_operand.vmem [shape: bf16[108,128], index: 1, kind: input, shape index: {}]   ;;  %s864_s2 = inlined_call_operand.vmem [shape: f32[1,128], index: 2, kind: input, shape index: {}]   ;;  %s865_s3 = inlined_call_operand.vmem [shape: bf16[128,64], index: 3, kind: input, shape index: {}]   ;;  %s866_s4 = inlined_call_operand.vmem [shape: f32[1,64], index: 4, kind: input, shape index: {}]   ;;  %s867_s5 = inlined_call_operand.vmem [shape: bf16[32,128], index: 5, kind: output, shape index: {0}]   ;;  %s868_s6 = inlined_call_operand.vmem [shape: bf16[32,64], index: 6, kind: output, shape index: {1}]  }
   0x1 LB: > { %s615_s22 = sadd.s32 4294967295, %s747_s21   ;;  %p619_p0 = scmp.ge.s32.totalorder %s747_s21, 1  ;;  %s747_s21 = sphi %s786_s21, %s17_s21  }
   0x2   : > { %p216_p1 = scmp.lt.s32.totalorder %s747_s21, 3 }
   0x4   : > { %p217_p2 = pnand %p619_p0, %p216_p1 }
   0x5   : > { %v725_v0 = vld [vmem:[%s863_s1] sm:$0xff] (!%p217_p2)   ;;  %v749_v1 = vmov (!%p217_p2), 0.0   ;;  %v726_v2 = vld [vmem:[%s863_s1 + $0x8] sm:$0xff] (!%p217_p2)   ;;  %vm750_vm0 = vmmov (!%p217_p2), 0   ;;  %s620_s27 = sshll.u32 (!%p217_p2), %s615_s22, 1  ;;  %v727_v3 = vld [vmem:[%s863_s1 + $0x10] sm:$0xff] (!%p217_p2)  }
   0x6   : > { %220 = sbr.rel (%p217_p2) target bundleno = 475 (0x1db), region = 40  ;;  %677 = vmatprep.subr.bf16.mxu0 (!%p217_p2), %v749_v1  ;;  %695 = vmatprep.subr.bf16.mxu1 (!%p217_p2), %v749_v1  ;;  %p252_p3 = scmp.lt.s32.totalorder (!%p217_p2), %s620_s27, 3  ;;  %v733_v4 = vld [vmem:[%s865_s3] sm:$0xff] (!%p217_p2)   ;;  %v734_v5 = vld [vmem:[%s865_s3 + $0x8] sm:$0xff] (!%p217_p2)   ;;  %v728_v6 = vld [vmem:[%s863_s1 + $0x18] sm:$0xff] (!%p217_p2)   ;;  %vm343_vm1 = vcmask (!%p217_p2), 1045504  }
   0x7   : > { %678 = vmatpush3.bf16.msra.mxu0 (!%p217_p2), %v725_v0  ;;  %691 = vmatprep.mubr.msk.bf16.mxu0 (!%p217_p2), %vm750_vm0, %v749_v1  ;;  %v735_v7 = vld [vmem:[%s865_s3 + $0x10] sm:$0xff] (!%p217_p2)   ;;  %v729_v8 = vld [vmem:[%s863_s1 + $0x20] sm:$0xff] (!%p217_p2)   ;;  %v736_v9 = vld [vmem:[%s865_s3 + $0x18] sm:$0xff] (!%p217_p2)   ;;  %vm339_vm2 = vcmask (!%p217_p2), 883712   ;;  %vm522_vm3 = vcmask (!%p217_p2), 519168  }
   0x8   : > { %679 = vmatprep.subr.bf16.mxu0 (!%p217_p2), %v749_v1  ;;  %711 = vmatprep.mubr.msk.bf16.mxu1 (!%p217_p2), %vm750_vm0, %v749_v1  ;;  %v730_v10 = vld [vmem:[%s863_s1 + $0x28] sm:$0xff] (!%p217_p2)   ;;  %v731_v11 = vld [vmem:[%s863_s1 + $0x30] sm:$0x3f] (!%p217_p2)   ;;  %v737_v12 = vld [vmem:[%s865_s3 + $0x20] sm:$0xff] (!%p217_p2)  }
   0x9   : > { %696 = vmatpush3.bf16.msra.mxu1 (!%p217_p2), %v733_v4  ;;  %v345_v13 = vsel (!%p217_p2), %vm343_vm1, %v731_v11, 0  ;;  %v738_v15 = vld [vmem:[%s865_s3 + $0x28] sm:$0xff] (!%p217_p2)   ;;  %v739_v16 = vld [vmem:[%s865_s3 + $0x30] sm:$0xff] (!%p217_p2)   ;;  %v740_v17 = vld [vmem:[%s865_s3 + $0x38] sm:$0xff] (!%p217_p2)  }
   0xa   : > { %697 = vmatprep.subr.bf16.mxu1 (!%p217_p2), %v749_v1  ;;  %v626_v18 = vld [vmem:[%s864_s2] ss:$0 sm:$0xff] (!%p217_p2) }
   0xb   : > { %680 = vmatpush3.bf16.msra.mxu0 (!%p217_p2), %v726_v2  ;;  %v638_v28 = vld [vmem:[%s866_s4] ss:$0 sm:$0xff] (!%p217_p2) }
   0xc   : > { %681 = vmatprep.subr.bf16.mxu0 (!%p217_p2), %v749_v1 }
   0xd   : > { %s870_s27 = smov (!%p252_p3, %s620_s27), 3  ;;  %698 = vmatpush3.bf16.msra.mxu1 %v734_v5 }
   0xe   : > { %s806_s8 = sshll.u32 %s870_s27, 2  ;;  %699 = vmatprep.subr.bf16.mxu1 %v749_v1 }
   0xf   : > { %682 = vmatpush3.bf16.msra.mxu0 %v727_v3  ;;  %s255_s15 = scalar_lea.vmem %s862_s0, %s806_s8  ;;  %s261_s16 = scalar_lea.vmem %s867_s5, %s806_s8 }
  0x10   : > { %683 = vmatprep.subr.bf16.mxu0 %v749_v1  ;;  %v732_v14 = vld [vmem:[%s255_s15] sm:$0xff]   ;;  %s267_s22 = scalar_lea.vmem %s868_s6, %s806_s8 }
  0x11   : > { %700 = vmatpush3.bf16.msra.mxu1 %v735_v7 }
  0x12   : > { %701 = vmatprep.subr.bf16.mxu1 %v749_v1 }
  0x13   : > { %684 = vmatpush3.bf16.msra.mxu0 %v728_v6 }
  0x14   : > { %685 = vmatprep.subr.bf16.mxu0 %v749_v1 }
  0x15   : > { %702 = vmatpush3.bf16.msra.mxu1 %v736_v9 }
  0x16   : > { %703 = vmatprep.subr.bf16.mxu1 %v749_v1 }
  0x17   : > { %686 = vmatpush3.bf16.msra.mxu0 %v729_v8 }
  0x18   : > { %687 = vmatprep.subr.bf16.mxu0 %v749_v1 }
  0x19   : > { %704 = vmatpush3.bf16.msra.mxu1 %v737_v12 }
  0x1a   : > { %705 = vmatprep.subr.bf16.mxu1 %v749_v1 }
  0x1b   : > { %688 = vmatpush3.bf16.msra.mxu0 %v730_v10 }
  0x1c   : > { %689 = vmatprep.subr.bf16.mxu0 %v749_v1 }
  0x1d   : > { %706 = vmatpush3.bf16.msra.mxu1 %v738_v15 }
  0x1e   : > { %707 = vmatprep.subr.bf16.mxu1 %v749_v1 }
  0x1f   : > { %690 = vmatpush3.bf16.msra.mxu0 %v345_v13 }
  0x21   : > { %708 = vmatpush3.bf16.msra.mxu1 %v739_v16 }
  0x22   : > { %692 = vmatmul.mubr.msk.bf16.vlgmr.msra.gmra.mrb[0].mxu0 %vm339_vm2, %v732_v14  ;;  %709 = vmatprep.subr.bf16.mxu1 %v749_v1 }
  0x25   : > { %710 = vmatpush3.bf16.msra.mxu1 %v740_v17 }
  0xf5   : > { %v381_v19 = vpop.f32.mrb[0].mxu0 }
  0xf6   : > { %v382_v20 = vadd.f32 %v626_v18, %v381_v19  ;;  %v693_v21 = vpop.f32.mrb[1].mxu0 }
  0xf7   : > { %v384_v22 = vpop.f32.mrb[2].mxu0 }
  0xf8   : > { %v385_v23 = vadd.f32 %v626_v18, %v384_v22  ;;  %v694_v24 = vpop.f32.mrb[3].mxu0  ;;  %v388_v25 = vmax.f32 %v382_v20, 0.0 }
  0xfa   : > { %v389_v26 = vmax.f32 %v385_v23, 0.0 }
  0xfc   : > { %v390_v27 = vpack.c.bf16 %v389_v26, %v388_v25 }
  0xfe   : > { %659 = vst [vmem:[%s261_s16] sm:$0xff] %v390_v27   ;;  %712 = vmatmul.mubr.bf16.vlgmr.msra.gmra.mrb[0].mxu1 %v390_v27 }
 0x1d1   : > { %v505_v29 = vpop.f32.mrb[0].mxu1 }
 0x1d2   : > { %v506_v30 = vadd.f32 %v638_v28, %v505_v29  ;;  %v713_v31 = vpop.f32.mrb[1].mxu1 }
 0x1d3   : > { %v508_v32 = vpop.f32.mrb[2].mxu1 }
 0x1d4   : > { %v512_v33 = vmax.f32 %v506_v30, 0.0  ;;  %v509_v34 = vadd.f32 %v638_v28, %v508_v32  ;;  %v714_v35 = vpop.f32.mrb[3].mxu1 }
 0x1d6   : > { %v653_v36 = vpack.c.bf16 %v512_v33, %v512_v33  ;;  %v513_v37 = vmax.f32 %v509_v34, 0.0 }
 0x1d8   : > { %523 = vst.msk [vmem:[%s267_s22] sm:$0xf] %vm522_vm3, %v653_v36  ;;  %v654_v38 = vpack.c.bf16 %v513_v37, %v513_v37 }
 0x1da   : > { %524 = vst.msk [vmem:[%s267_s22 + $0x4] sm:$0xf] %vm522_vm3, %v654_v38 }
 0x1db PF: > { %s17_s21 = sadd.s32 1, %s747_s21  }
 0x1dc   : > { %p14_p4 = scmp.ge.s32.totalorder %s17_s21, 4  }
 0x1de   :  { %16 = sbr.rel (!%p14_p4) target bundleno = 1 (0x1), region = 82 }

// kernel: stem_block_forward.4
= control target key start
LH: loop header
LB: loop body
LE: loop exit
PB: predicated region body
PF: predicated region fallthrough
CT: control target
= control target key end

     0   :  { %v608_v35 = vmov 0.0   ;;  %vm609_vm0 = vmmov 0   ;;  %vm330_vm1 = vcmask 523264   ;;  %s753_s1 = inlined_call_operand.vmem [shape: bf16[576,128], index: 1, kind: input, shape index: {}]   ;;  %s754_s0 = inlined_call_operand.vmem [shape: bf16[8,576], index: 0, kind: input, shape index: {}]   ;;  %s755_s2 = inlined_call_operand.vmem [shape: f32[1,128], index: 2, kind: input, shape index: {}]   ;;  %s756_s3 = inlined_call_operand.vmem [shape: bf16[8,128], index: 3, kind: output, shape index: {}]  }
   0x1   :  { %v567_v0 = vld [vmem:[%s753_s1 + $0x40] sm:$0xff]   ;;  %v571_v4 = vld [vmem:[%s753_s1 + $0x48] sm:$0xff]   ;;  %v575_v8 = vld [vmem:[%s753_s1 + $0x50] sm:$0xff]  }
   0x2   :  { %v568_v1 = vld [vmem:[%s753_s1] sm:$0xff]   ;;  %504 = vmatprep.subr.bf16.mxu0 %v567_v0  ;;  %v572_v5 = vld [vmem:[%s753_s1 + $0x8] sm:$0xff]   ;;  %v576_v9 = vld [vmem:[%s753_s1 + $0x10] sm:$0xff]  }
   0x3   :  { %v569_v2 = vld [vmem:[%s753_s1 + $0xc0] sm:$0xff]   ;;  %505 = vmatpush3.bf16.msra.mxu0 %v568_v1  ;;  %v573_v6 = vld [vmem:[%s753_s1 + $0xc8] sm:$0xff]   ;;  %v577_v10 = vld [vmem:[%s753_s1 + $0xd0] sm:$0xff]  }
   0x4   :  { %v570_v3 = vld [vmem:[%s753_s1 + $0x80] sm:$0xff]   ;;  %526 = vmatprep.subr.bf16.mxu1 %v569_v2  ;;  %506 = vmatprep.subr.bf16.mxu0 %v571_v4  ;;  %v574_v7 = vld [vmem:[%s753_s1 + $0x88] sm:$0xff]   ;;  %v578_v11 = vld [vmem:[%s753_s1 + $0x90] sm:$0xff]  }
   0x5   :  { %527 = vmatpush3.bf16.msra.mxu1 %v570_v3  ;;  %v579_v12 = vld [vmem:[%s753_s1 + $0x58] sm:$0xff]   ;;  %v583_v16 = vld [vmem:[%s753_s1 + $0x60] sm:$0xff]   ;;  %v587_v20 = vld [vmem:[%s753_s1 + $0x68] sm:$0xff]  }
   0x6   :  { %528 = vmatprep.subr.bf16.mxu1 %v573_v6  ;;  %v580_v13 = vld [vmem:[%s753_s1 + $0x18] sm:$0xff]   ;;  %v584_v17 = vld [vmem:[%s753_s1 + $0x20] sm:$0xff]   ;;  %v588_v21 = vld [vmem:[%s753_s1 + $0x28] sm:$0xff]  }
   0x7   :  { %507 = vmatpush3.bf16.msra.mxu0 %v572_v5  ;;  %v581_v14 = vld [vmem:[%s753_s1 + $0xd8] sm:$0xff]   ;;  %v585_v18 = vld [vmem:[%s753_s1 + $0xe0] sm:$0xff]   ;;  %v589_v22 = vld [vmem:[%s753_s1 + $0xe8] sm:$0xff]  }
   0x8   :  { %508 = vmatprep.subr.bf16.mxu0 %v575_v8  ;;  %v582_v15 = vld [vmem:[%s753_s1 + $0x98] sm:$0xff]   ;;  %v586_v19 = vld [vmem:[%s753_s1 + $0xa0] sm:$0xff]   ;;  %v590_v23 = vld [vmem:[%s753_s1 + $0xa8] sm:$0xff]  }
   0x9   :  { %529 = vmatpush3.bf16.msra.mxu1 %v574_v7  ;;  %v591_v24 = vld [vmem:[%s753_s1 + $0x70] sm:$0xff]   ;;  %v595_v28 = vld [vmem:[%s753_s1 + $0x78] sm:$0xff]   ;;  %v15_v31 = vld [vmem:[%s754_s0] sm:$0xff] }
   0xa   :  { %530 = vmatprep.subr.bf16.mxu1 %v577_v10  ;;  %v592_v25 = vld [vmem:[%s753_s1 + $0x30] sm:$0xff]   ;;  %v596_v29 = vld [vmem:[%s753_s1 + $0x38] sm:$0xff]   ;;  %v462_v32 = vcombine.low %v15_v31, %v15_v31  ;;  %v463_v33 = vcombine.high %v15_v31, %v15_v31  ;;  %v16_v36 = vld [vmem:[%s754_s0 + $0x8] sm:$0xff] }
   0xb   :  { %509 = vmatpush3.bf16.msra.mxu0 %v576_v9  ;;  %v593_v26 = vld [vmem:[%s753_s1 + $0xf0] sm:$0xff]   ;;  %v597_v30 = vld [vmem:[%s753_s1 + $0xf8] sm:$0xff]   ;;  %v464_v37 = vcombine.low %v16_v36, %v16_v36  ;;  %v465_v38 = vcombine.high %v16_v36, %v16_v36  ;;  %v604_v39 = vld [vmem:[%s753_s1 + $0x100] sm:$0xff]  }
   0xc   :  { %510 = vmatprep.subr.bf16.mxu0 %v579_v12  ;;  %v594_v27 = vld [vmem:[%s753_s1 + $0xb0] sm:$0xff]   ;;  %v601_v34 = vld [vmem:[%s753_s1 + $0xb8] sm:$0xff]   ;;  %366 = vmatprep.mubr.bf16.mxu0 %v463_v33  ;;  %v605_v40 = vld [vmem:[%s753_s1 + $0x108] sm:$0xff]  }
   0xd   :  { %531 = vmatpush3.bf16.msra.mxu1 %v578_v11  ;;  %406 = vmatprep.mubr.bf16.mxu1 %v465_v38  ;;  %v606_v41 = vld [vmem:[%s753_s1 + $0x110] sm:$0xff]   ;;  %v607_v42 = vld [vmem:[%s753_s1 + $0x118] sm:$0xff]   ;;  %v461_v45 = vld [vmem:[%s755_s2] ss:$0 sm:$0xff] }
   0xe   :  { %532 = vmatprep.subr.bf16.mxu1 %v581_v14  ;;  %v600_v43 = vld [vmem:[%s754_s0 + $0x10] ss:$0 sps:$4 sm:$0xff]  }
   0xf   :  { %511 = vmatpush3.bf16.msra.mxu0 %v580_v13 }
  0x10   :  { %512 = vmatprep.subr.bf16.mxu0 %v583_v16 }
  0x11   :  { %533 = vmatpush3.bf16.msra.mxu1 %v582_v15 }
  0x12   :  { %534 = vmatprep.subr.bf16.mxu1 %v585_v18 }
  0x13   :  { %513 = vmatpush3.bf16.msra.mxu0 %v584_v17 }
  0x14   :  { %514 = vmatprep.subr.bf16.mxu0 %v587_v20 }
  0x15   :  { %535 = vmatpush3.bf16.msra.mxu1 %v586_v19 }
  0x16   :  { %536 = vmatprep.subr.bf16.mxu1 %v589_v22 }
  0x17   :  { %515 = vmatpush3.bf16.msra.mxu0 %v588_v21 }
  0x18   :  { %516 = vmatprep.subr.bf16.mxu0 %v591_v24 }
  0x19   :  { %537 = vmatpush3.bf16.msra.mxu1 %v590_v23 }
  0x1a   :  { %538 = vmatprep.subr.bf16.mxu1 %v593_v26 }
  0x1b   :  { %517 = vmatpush3.bf16.msra.mxu0 %v592_v25 }
  0x1c   :  { %518 = vmatprep.subr.bf16.mxu0 %v595_v28 }
  0x1d   :  { %539 = vmatpush3.bf16.msra.mxu1 %v594_v27 }
  0x1e   :  { %540 = vmatprep.subr.bf16.mxu1 %v597_v30 }
  0x1f   :  { %519 = vmatpush3.bf16.msra.mxu0 %v596_v29 }
  0x20   :  { %553 = vmatprep.subr.bf16.mxu0 %v608_v35 }
  0x21   :  { %541 = vmatpush3.bf16.msra.mxu1 %v601_v34 }
  0x22   :  { %367 = vmatmul.mubr.bf16.vlgmr.msra.gmra.mrb[0].mxu0 %v462_v32 }
  0x23   :  { %554 = vmatpush3.bf16.msra.mxu0 %v604_v39  ;;  %561 = vmatprep.mubr.msk.bf16.mxu0 %vm609_vm0, %v608_v35 }
  0x24   :  { %407 = vmatmul.mubr.bf16.vlgmr.msra.gmra.mrb[0].mxu1 %v464_v37  ;;  %555 = vmatprep.subr.bf16.mxu0 %v608_v35 }
  0x27   :  { %556 = vmatpush3.bf16.msra.mxu0 %v605_v40 }
  0x28   :  { %557 = vmatprep.subr.bf16.mxu0 %v608_v35 }
  0x2b   :  { %558 = vmatpush3.bf16.msra.mxu0 %v606_v41 }
  0x2c   :  { %559 = vmatprep.subr.bf16.mxu0 %v608_v35 }
  0x2f   :  { %560 = vmatpush3.bf16.msra.mxu0 %v607_v42 }
  0x32   :  { %562 = vmatmul.mubr.msk.bf16.vlgmr.msra.gmra.mrb[4].mxu0 %vm330_vm1, %v600_v43 }
  0xf5   :  { %v520_v44 = vpop.f32.mrb[0].mxu0 }
  0xf6   :  { %v521_v46 = vpop.f32.mrb[1].mxu0 }
  0xf7   :  { %v522_v47 = vadd.f32 %v521_v46, %v520_v44  ;;  %v523_v48 = vpop.f32.mrb[2].mxu0  ;;  %v542_v49 = vpop.f32.mrb[0].mxu1 }
  0xf8   :  { %v524_v50 = vpop.f32.mrb[3].mxu0  ;;  %v543_v51 = vpop.f32.mrb[1].mxu1 }
  0xf9   :  { %v369_v52 = vadd.f32 %v522_v47, %v461_v45  ;;  %v544_v53 = vadd.f32 %v543_v51, %v542_v49  ;;  %v545_v54 = vpop.f32.mrb[2].mxu1 }
  0xfa   :  { %v546_v55 = vpop.f32.mrb[3].mxu1 }
  0xfb   :  { %v409_v56 = vadd.f32 %v544_v53, %v369_v52 }
 0x105   :  { %v448_v57 = vpop.f32.mrb[4].mxu0 }
 0x106   :  { %v449_v58 = vadd.f32 %v448_v57, %v409_v56  ;;  %v563_v59 = vpop.f32.mrb[5].mxu0 }
 0x107   :  { %v451_v60 = vpop.f32.mrb[6].mxu0 }
 0x108   :  { %v454_v61 = vmax.f32 %v449_v58, 0.0  ;;  %v564_v62 = vpop.f32.mrb[7].mxu0 }
 0x10a   :  { %v455_v63 = vpack.c.bf16 %v454_v61, %v454_v61 }
 0x10c   :  { %456 = vst [vmem:[%s756_s3] sm:$0xf] %v455_v63 }

// kernel: stem_block_forward.5
= control target key start
LH: loop header
LB: loop body
LE: loop exit
PB: predicated region body
PF: predicated region fallthrough
CT: control target
= control target key end

     0   :  { %s663_s21 = smov 0   ;;  %s709_s0 = inlined_call_operand.vmem [shape: bf16[32,32], index: 0, kind: input, shape index: {}]   ;;  %s710_s1 = inlined_call_operand.vmem [shape: bf16[32,64], index: 1, kind: input, shape index: {}]   ;;  %s711_s2 = inlined_call_operand.vmem [shape: bf16[32,64], index: 2, kind: input, shape index: {}]   ;;  %s712_s3 = inlined_call_operand.vmem [shape: bf16[32,32], index: 3, kind: input, shape index: {}]   ;;  %s713_s4 = inlined_call_operand.vmem [shape: bf16[32,32], index: 4, kind: input, shape index: {}]   ;;  %s714_s5 = inlined_call_operand.vmem [shape: f32[1,32], index: 5, kind: input, shape index: {}]   ;;  %s715_s6 = inlined_call_operand.vmem [shape: bf16[32,32], index: 6, kind: output, shape index: {}]  }
   0x1 LB: > { %s551_s22 = sadd.s32 4294967295, %s623_s21   ;;  %p555_p0 = scmp.ge.s32.totalorder %s623_s21, 1  ;;  %s623_s21 = sphi %s663_s21, %s16_s21  }
   0x2   : > { %p235_p1 = scmp.lt.s32.totalorder %s623_s21, 3 }
   0x4   : > { %p236_p2 = pnand %p555_p0, %p235_p1 }
   0x5   : > { %s556_s23 = sshll.u32 (!%p236_p2), %s551_s22, 1  ;;  %v612_v0 = vld [vmem:[%s712_s3] sm:$0xff] (!%p236_p2)   ;;  %v625_v1 = vmov (!%p236_p2), 0.0   ;;  %v614_v3 = vld [vmem:[%s712_s3 + $0x8] sm:$0xff] (!%p236_p2)   ;;  %vm626_vm0 = vmmov (!%p236_p2), 0   ;;  %vm343_vm1 = vcmask (!%p236_p2), 261120  }
   0x6   : > { %239 = sbr.rel (%p236_p2) target bundleno = 366 (0x16e), region = 44  ;;  %p276_p3 = scmp.lt.s32.totalorder (!%p236_p2), %s556_s23, 3  ;;  %593 = vmatprep.subr.bf16.mxu1 (!%p236_p2), %v625_v1  ;;  %585 = vmatprep.subr.bf16.mxu0 (!%p236_p2), %v625_v1  ;;  %v613_v2 = vld [vmem:[%s713_s4] sm:$0xff] (!%p236_p2)   ;;  %v615_v4 = vld [vmem:[%s713_s4 + $0x8] sm:$0xff] (!%p236_p2)   ;;  %vm468_vm2 = vcmask (!%p236_p2), 257024  }
   0x7   : > { %594 = vmatpush3.bf16.msra.mxu1 (!%p236_p2), %v612_v0  ;;  %586 = vmatpush3.bf16.msra.mxu0 (!%p236_p2), %v613_v2  ;;  %s627_s18 = smov (!%p236_p2), 96   ;;  %v572_v22 = vld [vmem:[%s714_s5] ss:$0 sm:$0xff] (!%p236_p2) }
   0x8   : > { %595 = vmatprep.subr.bf16.mxu1 (!%p236_p2), %v625_v1  ;;  %587 = vmatprep.subr.bf16.mxu0 (!%p236_p2), %v625_v1 }
   0x9   : > { %597 = vmatprep.mubr.msk.bf16.mxu1 (!%p236_p2), %vm626_vm0, %v625_v1  ;;  %589 = vmatprep.mubr.msk.bf16.mxu0 (!%p236_p2), %vm626_vm0, %v625_v1 }
   0xb   : > { %596 = vmatpush3.bf16.msra.mxu1 (!%p236_p2), %v614_v3  ;;  %588 = vmatpush3.bf16.msra.mxu0 (!%p236_p2), %v615_v4 }
   0xd   : > { %s717_s23 = smov (!%p276_p3, %s556_s23), 3 }
   0xe   : > { %s683_s8 = sshll.u32 %s717_s23, 2 }
   0xf   : > { %s285_s11 = scalar_lea.vmem %s710_s1, %s683_s8  ;;  %s291_s14 = scalar_lea.vmem %s711_s2, %s683_s8 }
  0x10   : > { %v300_v5 = vld [vmem:[%s285_s11] sm:$0xf]  ;;  %v301_v6 = vld [vmem:[%s285_s11 + $0x4] sm:$0xf]  ;;  %s279_s17 = scalar_lea.vmem %s709_s0, %s683_s8  ;;  %s297_s24 = scalar_lea.vmem %s715_s6, %s683_s8 }
  0x11   : > { %v302_v7 = vld [vmem:[%s291_s14] sm:$0xf]  ;;  %v303_v8 = vld [vmem:[%s291_s14 + $0x4] sm:$0xf] }
  0x12   : > { %v304_v9 = vmax.bf16 %v302_v7, %v300_v5  ;;  %v616_v10 = vld [vmem:[%s279_s17] sm:$0xff]   ;;  %v305_v11 = vmax.bf16 %v303_v8, %v301_v6 }
  0x13   : > { %598 = vmatmul.mubr.msk.bf16.vlgmr.msra.gmra.mrb[0].mxu1 %vm343_vm1, %v616_v10 }
  0x14   : > { %308 = vrot.lane.b32.xlu0 %v304_v9, %s627_s18 }
  0x18   : > { %310 = vrot.lane.b32.xlu0 %v305_v11, %s627_s18 }
  0x86   : > { %v309_v12 = vpop.permute.xlu0 %308 }
  0x87   : > { %v314_v14 = vmax.bf16 %v309_v12, %v304_v9 }
  0x8a   : > { %v311_v13 = vpop.permute.xlu0 %310 }
  0x8b   : > { %v315_v15 = vmax.bf16 %v311_v13, %v305_v11 }
  0x8d   : > { %v564_v16 = vcombine.low %v314_v14, %v315_v15 }
  0x8f   : > { %590 = vmatmul.mubr.msk.bf16.vlgmr.msra.gmra.mrb[0].mxu0 %vm343_vm1, %v564_v16 }
  0xe6   : > { %v442_v17 = vpop.f32.mrb[0].mxu1 }
  0xe7   : > { %v599_v18 = vpop.f32.mrb[1].mxu1 }
  0xe8   : > { %v445_v19 = vpop.f32.mrb[2].mxu1 }
  0xe9   : > { %v600_v20 = vpop.f32.mrb[3].mxu1 }
 0x162   : > { %v381_v21 = vpop.f32.mrb[0].mxu0 }
 0x163   : > { %v443_v23 = vadd.f32 %v442_v17, %v381_v21  ;;  %v591_v24 = vpop.f32.mrb[1].mxu0 }
 0x164   : > { %v384_v25 = vpop.f32.mrb[2].mxu0 }
 0x165   : > { %v456_v26 = vadd.f32 %v572_v22, %v443_v23  ;;  %v446_v27 = vadd.f32 %v445_v19, %v384_v25  ;;  %v592_v28 = vpop.f32.mrb[3].mxu0 }
 0x167   : > { %v458_v29 = vmax.f32 %v456_v26, 0.0  ;;  %v457_v30 = vadd.f32 %v572_v22, %v446_v27 }
 0x169   : > { %v577_v31 = vpack.c.bf16 %v458_v29, %v458_v29  ;;  %v459_v32 = vmax.f32 %v457_v30, 0.0 }
 0x16b   : > { %469 = vst.msk [vmem:[%s297_s24] sm:$0xf] %vm468_vm2, %v577_v31  ;;  %v578_v33 = vpack.c.bf16 %v459_v32, %v459_v32 }
 0x16d   : > { %470 = vst.msk [vmem:[%s297_s24 + $0x4] sm:$0xf] %vm468_vm2, %v578_v33 }
 0x16e PF: > { %s16_s21 = sadd.s32 1, %s623_s21  }
 0x16f   : > { %p13_p4 = scmp.ge.s32.totalorder %s16_s21, 4  }
 0x171   :  { %15 = sbr.rel (!%p13_p4) target bundleno = 1 (0x1), region = 80 }

</bundles_post_ra>
